<compile_context>
chip_gen: v6e
topology: v6e:2x2x1
jax: 0.10.0
libtpu: 0.0.40
codegen_flags: <defaults>
</compile_context>

<pallas_src>
import math

import numpy as np
import jax
import jax.numpy as jnp
from jax.experimental import pallas as pl
from jax.experimental.pallas import tpu as pltpu


def _round_up(a, m):
    return ((a + m - 1) // m) * m


def _is_v7x():
    try:
        kind = jax.devices()[0].device_kind.lower()
    except Exception:
        return False
    return ("v7" in kind) or ("tpu7" in kind) or ("7x" in kind)


def make_textcnn_kernel(tb, n_windows, tail_full, k, d, nf):
    """tb: batch tile, n_windows: T, tail_full: #windows valid for ALL filter sizes,
    k: im2col contraction dim (max_fs*D), d: embed dim, nf: n_filters_total."""

    def kernel(x_ref, wconv_ref, bconv_ref, mask_ref, wlin_ref, blin_ref, out_ref):
        xf = x_ref[...]                                     # (TB, L_flat) bf16, lane-dense

        # In-kernel im2col: window t is the contiguous 128-lane slice at lane offset t*D.
        # Stack along the LEADING axis so layout stays natural (no sublane interleave).
        windows = [xf[:, t * d:t * d + k] for t in range(n_windows)]
        patches = jnp.stack(windows, axis=0)                # (T, TB, K) bf16
        patches = patches.reshape(n_windows * tb, k)        # (T*TB, K) bf16

        # All conv filters in a single K=128 bf16 MXU matmul, f32 accumulation.
        acc = jnp.dot(patches, wconv_ref[...],
                      preferred_element_type=jnp.float32)   # (T*TB, NF) f32
        acc = jnp.maximum(acc + bconv_ref[...], 0.0)        # bias + ReLU (f32)
        acc3 = acc.reshape(n_windows, tb, nf)               # (T, TB, NF)

        # max_pool1d over time. Windows t < tail_full are valid for every filter size.
        # Tail windows get the precomputed {0,1} validity mask (exact: ReLU output >= 0).
        pooled = jnp.max(acc3[:tail_full], axis=0)          # (TB, NF) f32
        if tail_full < n_windows:
            mask = mask_ref[...]                            # (T, NF) f32 constant
            for t in range(tail_full, n_windows):
                pooled = jnp.maximum(pooled, acc3[t] * mask[t:t + 1, :])

        # Dropout is identity in eval mode.
        # TODO(synk): training-mode dropout (pltpu.prng_*) not implemented.

        # Final Linear (bf16 operands, f32 accumulate), lane-dense C_pad columns.
        logits = jnp.dot(pooled.astype(jnp.bfloat16), wlin_ref[...],
                         preferred_element_type=jnp.float32)
        out_ref[...] = (logits + blin_ref[...]).astype(out_ref.dtype)

    return kernel


def textcnn_forward(x_embed, conv_ws, conv_bs, linear_w, linear_b,
                    filter_sizes, *, batch_tile=None):
    """x_embed: (B, L, D) float32. Returns logits (B, C) float32."""
    B, L, D = x_embed.shape
    F = conv_ws[0].shape[-1]
    n_fs = len(filter_sizes)
    NF = n_fs * F
    C = linear_w.shape[-1]
    max_fs = max(filter_sizes)
    min_fs = min(filter_sizes)
    T = L - min_fs + 1                    # candidate window positions (smallest filter)
    K = max_fs * D                        # im2col contraction dim (== 128 here)
    tail_full = L - max_fs + 1            # windows valid for ALL filter sizes

    # ---- one-time parameter packing (host side) ----------------------------
    # Combined conv weight: rows >= fs*D are zero for filter k, so the K=128 dot is exact.
    w_conv = jnp.zeros((K, NF), jnp.float32)
    for ki, (fs, w) in enumerate(zip(filter_sizes, conv_ws)):
        w_conv = w_conv.at[:fs * D, ki * F:(ki + 1) * F].set(
            w.reshape(fs * D, F).astype(jnp.float32))
    w_conv = w_conv.astype(jnp.bfloat16)                                   # bf16 MXU operand
    b_conv = jnp.concatenate(
        [b.reshape(1, F).astype(jnp.float32) for b in conv_bs], axis=-1)   # (1, NF) f32

    C_pad = _round_up(max(C, 1), 128)     # lane-dense output columns
    w_lin = jnp.zeros((NF, C_pad), jnp.float32).at[:, :C].set(
        linear_w.astype(jnp.float32)).astype(jnp.bfloat16)                 # bf16 MXU operand
    b_lin = jnp.zeros((1, C_pad), jnp.float32).at[:, :C].set(
        linear_b.reshape(1, C).astype(jnp.float32))

    # Compile-time validity mask: window t is valid for filter fs iff t <= L - fs.
    limit_per_col = np.repeat(np.asarray([L - fs for fs in filter_sizes], np.int64), F)
    mask_np = (np.arange(T)[:, None] <= limit_per_col[None, :]).astype(np.float32)
    mask = jnp.asarray(mask_np)                                            # (T, NF) f32

    # ---- generation-aware batch tiling --------------------------------------
    is_v7 = _is_v7x()
    tb_cap = 1024 if is_v7 else 2048                  # v7x: 64 MiB VMEM -> smaller cap
    if batch_tile is not None:
        tb_cap = max(16, _round_up(int(batch_tile), 16))
    B_pad = _round_up(B, 16)                          # bf16 sublane granularity
    TB = min(tb_cap, B_pad)
    if is_v7 and B_pad > 16:                          # 2 TCs: give megacore >= 2 grid steps
        TB = min(TB, _round_up((B_pad + 1) // 2, 16))
    B_pad = _round_up(B_pad, TB)
    grid = (B_pad // TB,)
    vmem_limit = (32 << 20) if is_v7 else (64 << 20)

    # ---- lane-dense flattened bf16 input ------------------------------------
    # L_flat covers every 128-lane window read by the im2col; padding is zero, which
    # only multiplies zero weight rows or gets masked before the pool.
    L_flat = _round_up(max(L * D, (T - 1) * D + K), 128)
    x = jnp.zeros((B_pad, L_flat), jnp.bfloat16)
    x = x.at[:B, :L * D].set(x_embed.reshape(B, L * D).astype(jnp.bfloat16))

    kernel = make_textcnn_kernel(TB, T, tail_full, K, D, NF)

    out = pl.pallas_call(
        kernel,
        out_shape=jax.ShapeDtypeStruct((B_pad, C_pad), jnp.bfloat16),
        grid=grid,
        in_specs=[
            pl.BlockSpec((TB, L_flat), lambda b: (b, 0)),
            pl.BlockSpec((K, NF), lambda b: (0, 0)),
            pl.BlockSpec((1, NF), lambda b: (0, 0)),
            pl.BlockSpec((T, NF), lambda b: (0, 0)),
            pl.BlockSpec((NF, C_pad), lambda b: (0, 0)),
            pl.BlockSpec((1, C_pad), lambda b: (0, 0)),
        ],
        out_specs=pl.BlockSpec((TB, C_pad), lambda b: (b, 0)),
        compiler_params=pltpu.CompilerParams(
            dimension_semantics=("parallel",),
            vmem_limit_bytes=vmem_limit),
    )(x, w_conv, b_conv, mask, w_lin, b_lin)

    return out[:B, :C].astype(jnp.float32)


def textcnn_reference(x_embed, conv_ws, conv_bs, linear_w, linear_b, filter_sizes):
    """Pure-JAX reference mirroring the PyTorch forward (eval mode) with the same
    bf16 operand rounding as the kernel (x, weights, pooled features, output)."""
    hp = jax.lax.Precision.HIGHEST
    xq = x_embed.astype(jnp.bfloat16).astype(jnp.float32)
    pooled = []
    for fs, w, b in zip(filter_sizes, conv_ws, conv_bs):
        wq = w.astype(jnp.bfloat16).astype(jnp.float32)
        T = xq.shape[1] - fs + 1
        acc = jnp.stack(
            [jnp.einsum('bld,ldf->bf', xq[:, t:t + fs, :], wq, precision=hp)
             for t in range(T)], axis=1) + b.reshape(1, 1, -1)          # (B, T, F)
        acc = jnp.maximum(acc, 0.0)
        pooled.append(jnp.max(acc, axis=1))                             # (B, F)
    feat = jnp.concatenate(pooled, axis=-1)                             # (B, n_fs*F)
    featq = feat.astype(jnp.bfloat16).astype(jnp.float32)
    wlq = linear_w.astype(jnp.bfloat16).astype(jnp.float32)
    logits = jnp.dot(featq, wlq, precision=hp) + linear_b.reshape(1, -1)
    return logits.astype(jnp.bfloat16).astype(jnp.float32)


if __name__ == "__main__":
    # --- config (small, consistent with the module) ---
    vocab_size = 50
    w_embed_dim = 24
    position_embed_dim = 8
    filter_sizes = (2, 3, 4)
    filter_num = 8
    num_classes = 5
    batch = 2
    max_fs = max(filter_sizes)
    seq_len = 2 * max_fs + 1                          # len(self.positions)
    full_embed_dim = w_embed_dim + position_embed_dim

    # --- deterministic parameter init ---
    ks = jax.random.split(jax.random.PRNGKey(0), 10)
    word_embed_tbl = jax.random.normal(ks[0], (vocab_size, w_embed_dim), jnp.float32)
    pos_embed_tbl = jax.random.normal(ks[1], (seq_len, position_embed_dim), jnp.float32)

    conv_ws, conv_bs = [], []
    for i, fs in enumerate(filter_sizes):
        bound = 1.0 / math.sqrt(fs * full_embed_dim)
        conv_ws.append(jax.random.uniform(
            ks[2 + i], (fs, full_embed_dim, filter_num), jnp.float32, -bound, bound))
        conv_bs.append(jax.random.uniform(
            ks[5 + i], (1, filter_num), jnp.float32, -bound, bound))

    lin_in = len(filter_sizes) * filter_num
    lbound = 1.0 / math.sqrt(lin_in)
    linear_w = jax.random.uniform(ks[8], (lin_in, num_classes), jnp.float32, -lbound, lbound)
    linear_b = jax.random.uniform(ks[9], (1, num_classes), jnp.float32, -lbound, lbound)

    # --- inputs ---
    tokens = jax.random.randint(jax.random.PRNGKey(1), (batch, seq_len), 0, vocab_size)
    positions = jnp.arange(seq_len, dtype=jnp.int32)  # self.positions

    # --- embedding glue (plain JAX): word_embed + broadcast position_embed, concat ---
    we = word_embed_tbl[tokens]                                   # (B, L, Wd)
    pe = jnp.broadcast_to(pos_embed_tbl[positions][None],
                          (batch, seq_len, position_embed_dim))   # (B, L, Pd)
    x = jnp.concatenate([we, pe], axis=-1).astype(jnp.float32)    # (B, L, D)

    logits = textcnn_forward(x, conv_ws, conv_bs, linear_w, linear_b, filter_sizes)
    logits = jax.block_until_ready(logits)
    assert logits.shape == (batch, num_classes)
    assert bool(jnp.all(jnp.isfinite(logits)))

    ref = textcnn_reference(x, conv_ws, conv_bs, linear_w, linear_b, filter_sizes)
    assert bool(jnp.allclose(logits, ref, rtol=2e-2, atol=2e-2)), (
        "max abs diff = %f" % float(jnp.max(jnp.abs(logits - ref))))
    print("KERNEL_OK")
</pallas_src>

<mosaic_0001>
module attributes {stable_mosaic.version = 11 : i64} {
  func.func @kernel(%arg0: i32, %arg1: memref<16x384xbf16, #tpu.memory_space<vmem>>, %arg2: memref<128x24xbf16, #tpu.memory_space<vmem>>, %arg3: memref<1x24xf32, #tpu.memory_space<vmem>>, %arg4: memref<8x24xf32, #tpu.memory_space<vmem>>, %arg5: memref<24x128xbf16, #tpu.memory_space<vmem>>, %arg6: memref<1x128xf32, #tpu.memory_space<vmem>>, %arg7: memref<16x128xbf16, #tpu.memory_space<vmem>>) attributes {dimension_semantics = [#tpu.dimension_semantics<parallel>], iteration_bounds = array<i64: 1>, scalar_prefetch = 0 : i64, scratch_operands = 0 : i64, tpu.core_type = #tpu.core_type<tc>, window_params = [{transform_indices = @transform_0, window_bounds = array<i64: 16, 384>}, {pipeline_mode = #tpu.pipeline_mode<synchronous>, transform_indices = @transform_1, window_bounds = array<i64: 128, 24>}, {pipeline_mode = #tpu.pipeline_mode<synchronous>, transform_indices = @transform_2, window_bounds = array<i64: 1, 24>}, {pipeline_mode = #tpu.pipeline_mode<synchronous>, transform_indices = @transform_3, window_bounds = array<i64: 8, 24>}, {pipeline_mode = #tpu.pipeline_mode<synchronous>, transform_indices = @transform_4, window_bounds = array<i64: 24, 128>}, {pipeline_mode = #tpu.pipeline_mode<synchronous>, transform_indices = @transform_5, window_bounds = array<i64: 1, 128>}, {transform_indices = @transform_6, window_bounds = array<i64: 16, 128>}]} {
    %c0 = arith.constant 0 : index
    %c0_0 = arith.constant 0 : index
    %0 = vector.load %arg1[%c0, %c0_0] : memref<16x384xbf16, #tpu.memory_space<vmem>>, vector<16x384xbf16>
    %1 = vector.extract_strided_slice %0 {offsets = [0, 0], sizes = [16, 128], strides = [1, 1]} : vector<16x384xbf16> to vector<16x128xbf16>
    %2 = vector.extract_strided_slice %0 {offsets = [0, 32], sizes = [16, 128], strides = [1, 1]} : vector<16x384xbf16> to vector<16x128xbf16>
    %3 = vector.extract_strided_slice %0 {offsets = [0, 64], sizes = [16, 128], strides = [1, 1]} : vector<16x384xbf16> to vector<16x128xbf16>
    %4 = vector.extract_strided_slice %0 {offsets = [0, 96], sizes = [16, 128], strides = [1, 1]} : vector<16x384xbf16> to vector<16x128xbf16>
    %5 = vector.extract_strided_slice %0 {offsets = [0, 128], sizes = [16, 128], strides = [1, 1]} : vector<16x384xbf16> to vector<16x128xbf16>
    %6 = vector.extract_strided_slice %0 {offsets = [0, 160], sizes = [16, 128], strides = [1, 1]} : vector<16x384xbf16> to vector<16x128xbf16>
    %7 = vector.extract_strided_slice %0 {offsets = [0, 192], sizes = [16, 128], strides = [1, 1]} : vector<16x384xbf16> to vector<16x128xbf16>
    %8 = vector.extract_strided_slice %0 {offsets = [0, 224], sizes = [16, 128], strides = [1, 1]} : vector<16x384xbf16> to vector<16x128xbf16>
    %9 = vector.shape_cast %1 : vector<16x128xbf16> to vector<1x16x128xbf16>
    %10 = vector.shape_cast %2 : vector<16x128xbf16> to vector<1x16x128xbf16>
    %11 = vector.shape_cast %3 : vector<16x128xbf16> to vector<1x16x128xbf16>
    %12 = vector.shape_cast %4 : vector<16x128xbf16> to vector<1x16x128xbf16>
    %13 = vector.shape_cast %5 : vector<16x128xbf16> to vector<1x16x128xbf16>
    %14 = vector.shape_cast %6 : vector<16x128xbf16> to vector<1x16x128xbf16>
    %15 = vector.shape_cast %7 : vector<16x128xbf16> to vector<1x16x128xbf16>
    %16 = vector.shape_cast %8 : vector<16x128xbf16> to vector<1x16x128xbf16>
    %17 = tpu.concatenate %9, %10, %11, %12, %13, %14, %15, %16 in 0 : vector<1x16x128xbf16>, vector<1x16x128xbf16>, vector<1x16x128xbf16>, vector<1x16x128xbf16>, vector<1x16x128xbf16>, vector<1x16x128xbf16>, vector<1x16x128xbf16>, vector<1x16x128xbf16> -> vector<8x16x128xbf16>
    %18 = vector.shape_cast %17 : vector<8x16x128xbf16> to vector<128x128xbf16>
    %c0_1 = arith.constant 0 : index
    %c0_2 = arith.constant 0 : index
    %19 = vector.load %arg2[%c0_1, %c0_2] : memref<128x24xbf16, #tpu.memory_space<vmem>>, vector<128x24xbf16>
    %cst = arith.constant dense<0.000000e+00> : vector<128x24xf32>
    %20 = tpu.matmul %18, %19, %cst {dimension_numbers = #tpu.dot_dimension_numbers<[1], [0], [0], [1], [0, 0, 1, 1], [], []>} : vector<128x128xbf16>, vector<128x24xbf16>, vector<128x24xf32> -> vector<128x24xf32>
    %c0_3 = arith.constant 0 : index
    %c0_4 = arith.constant 0 : index
    %21 = vector.load %arg3[%c0_3, %c0_4] : memref<1x24xf32, #tpu.memory_space<vmem>>, vector<1x24xf32>
    %22 = vector.broadcast %21 : vector<1x24xf32> to vector<128x24xf32>
    %23 = arith.addf %20, %22 : vector<128x24xf32>
    %cst_5 = arith.constant 0.000000e+00 : f32
    %24 = vector.broadcast %cst_5 : f32 to vector<128x24xf32>
    %25 = arith.maximumf %23, %24 : vector<128x24xf32>
    %26 = vector.shape_cast %25 : vector<128x24xf32> to vector<8x16x24xf32>
    %27 = vector.extract_strided_slice %26 {offsets = [0, 0, 0], sizes = [6, 16, 24], strides = [1, 1, 1]} : vector<8x16x24xf32> to vector<6x16x24xf32>
    %cst_6 = arith.constant dense<0xFF800000> : vector<16x24xf32>
    %28 = vector.multi_reduction <maximumf>, %27, %cst_6 [0] : vector<6x16x24xf32> to vector<16x24xf32>
    %c0_7 = arith.constant 0 : index
    %c0_8 = arith.constant 0 : index
    %29 = vector.load %arg4[%c0_7, %c0_8] : memref<8x24xf32, #tpu.memory_space<vmem>>, vector<8x24xf32>
    %30 = vector.extract_strided_slice %26 {offsets = [6, 0, 0], sizes = [1, 16, 24], strides = [1, 1, 1]} : vector<8x16x24xf32> to vector<1x16x24xf32>
    %31 = vector.shape_cast %30 : vector<1x16x24xf32> to vector<16x24xf32>
    %32 = vector.extract_strided_slice %29 {offsets = [6, 0], sizes = [1, 24], strides = [1, 1]} : vector<8x24xf32> to vector<1x24xf32>
    %33 = vector.broadcast %32 : vector<1x24xf32> to vector<16x24xf32>
    %34 = arith.mulf %31, %33 : vector<16x24xf32>
    %35 = arith.maximumf %28, %34 : vector<16x24xf32>
    %36 = vector.extract_strided_slice %26 {offsets = [7, 0, 0], sizes = [1, 16, 24], strides = [1, 1, 1]} : vector<8x16x24xf32> to vector<1x16x24xf32>
    %37 = vector.shape_cast %36 : vector<1x16x24xf32> to vector<16x24xf32>
    %38 = vector.extract_strided_slice %29 {offsets = [7, 0], sizes = [1, 24], strides = [1, 1]} : vector<8x24xf32> to vector<1x24xf32>
    %39 = vector.broadcast %38 : vector<1x24xf32> to vector<16x24xf32>
    %40 = arith.mulf %37, %39 : vector<16x24xf32>
    %41 = arith.maximumf %35, %40 : vector<16x24xf32>
    %42 = arith.truncf %41 : vector<16x24xf32> to vector<16x24xbf16>
    %c0_9 = arith.constant 0 : index
    %c0_10 = arith.constant 0 : index
    %43 = vector.load %arg5[%c0_9, %c0_10] : memref<24x128xbf16, #tpu.memory_space<vmem>>, vector<24x128xbf16>
    %cst_11 = arith.constant dense<0.000000e+00> : vector<16x128xf32>
    %44 = tpu.matmul %42, %43, %cst_11 {dimension_numbers = #tpu.dot_dimension_numbers<[1], [0], [0], [1], [0, 0, 1, 1], [], []>} : vector<16x24xbf16>, vector<24x128xbf16>, vector<16x128xf32> -> vector<16x128xf32>
    %c0_12 = arith.constant 0 : index
    %c0_13 = arith.constant 0 : index
    %45 = vector.load %arg6[%c0_12, %c0_13] : memref<1x128xf32, #tpu.memory_space<vmem>>, vector<1x128xf32>
    %46 = vector.broadcast %45 : vector<1x128xf32> to vector<16x128xf32>
    %47 = arith.addf %44, %46 : vector<16x128xf32>
    %48 = arith.truncf %47 : vector<16x128xf32> to vector<16x128xbf16>
    %c0_14 = arith.constant 0 : index
    %c0_15 = arith.constant 0 : index
    %49 = vector.load %arg7[%c0_14, %c0_15] : memref<16x128xbf16, #tpu.memory_space<vmem>>, vector<16x128xbf16>
    tpu.vector_store %arg7[%c0_14, %c0_15], %48 {strides = array<i32>} : memref<16x128xbf16, #tpu.memory_space<vmem>>, vector<16x128xbf16>,
    return
  }
  func.func @transform_0(%arg0: i32) -> (i32, i32) {
    %c0_i32 = arith.constant 0 : i32
    %c0_i32_0 = arith.constant 0 : i32
    return %arg0, %c0_i32 : i32, i32
  }
  func.func @transform_1(%arg0: i32) -> (i32, i32) {
    %c0_i32 = arith.constant 0 : i32
    %c0_i32_0 = arith.constant 0 : i32
    %c0_i32_1 = arith.constant 0 : i32
    return %c0_i32, %c0_i32_0 : i32, i32
  }
  func.func @transform_2(%arg0: i32) -> (i32, i32) {
    %c0_i32 = arith.constant 0 : i32
    %c0_i32_0 = arith.constant 0 : i32
    %c0_i32_1 = arith.constant 0 : i32
    return %c0_i32, %c0_i32_0 : i32, i32
  }
  func.func @transform_3(%arg0: i32) -> (i32, i32) {
    %c0_i32 = arith.constant 0 : i32
    %c0_i32_0 = arith.constant 0 : i32
    %c0_i32_1 = arith.constant 0 : i32
    return %c0_i32, %c0_i32_0 : i32, i32
  }
  func.func @transform_4(%arg0: i32) -> (i32, i32) {
    %c0_i32 = arith.constant 0 : i32
    %c0_i32_0 = arith.constant 0 : i32
    %c0_i32_1 = arith.constant 0 : i32
    return %c0_i32, %c0_i32_0 : i32, i32
  }
  func.func @transform_5(%arg0: i32) -> (i32, i32) {
    %c0_i32 = arith.constant 0 : i32
    %c0_i32_0 = arith.constant 0 : i32
    %c0_i32_1 = arith.constant 0 : i32
    return %c0_i32, %c0_i32_0 : i32, i32
  }
  func.func @transform_6(%arg0: i32) -> (i32, i32) {
    %c0_i32 = arith.constant 0 : i32
    %c0_i32_0 = arith.constant 0 : i32
    return %arg0, %c0_i32 : i32, i32
  }
}

</mosaic_0001>

<bundles_post_ra>
// kernel: tpu_custom_call.1
= control target key start
LH: loop header
LB: loop body
LE: loop exit
PB: predicated region body
PF: predicated region fallthrough
CT: control target
= control target key end

     0   :  { %s575_s25 = smov 64   ;;  %s576_s26 = smov 96   ;;  %s705_s0 = inlined_call_operand.vmem [shape: bf16[16,384], index: 0, kind: input, shape index: {}]   ;;  %s706_s1 = inlined_call_operand.vmem [shape: bf16[128,24], index: 1, kind: input, shape index: {}]   ;;  %s707_s2 = inlined_call_operand.vmem [shape: f32[1,24], index: 2, kind: input, shape index: {}]   ;;  %s708_s3 = inlined_call_operand.vmem [shape: f32[8,24], index: 3, kind: input, shape index: {}]   ;;  %s709_s4 = inlined_call_operand.vmem [shape: bf16[24,128], index: 4, kind: input, shape index: {}]   ;;  %s710_s5 = inlined_call_operand.vmem [shape: f32[1,128], index: 5, kind: input, shape index: {}]   ;;  %s711_s6 = inlined_call_operand.hbm [shape: bf16[16,128], index: 6, kind: output, shape index: {}]  }
   0x1   :  { %v25_v0 = vld [vmem:[%s705_s0] sm:$0xff]  ;;  %v27_v1 = vld [vmem:[%s705_s0 + $0xc] sm:$0xff]  ;;  %v542_v3 = vld [vmem:[%s706_s1 + $0x38] sm:$0xff]   ;;  %s577_s11 = smov 32  }
   0x2   :  { %48 = vrot.lane.b32.xlu1 %v25_v0, %s575_s25  ;;  %35 = vrot.lane.b32.xlu0 %v25_v0, %s576_s26  ;;  %v431_v2 = vcombine.low %v25_v0, %v27_v1  ;;  %v543_v4 = vld [vmem:[%s706_s1 + $0x30] sm:$0xff]   ;;  %v544_v5 = vld [vmem:[%s706_s1 + $0x28] sm:$0xff]   ;;  %v31_v7 = vrot.slane %v25_v0, 4  ;;  %v32_v8 = vrot.slane %v27_v1, 4 }
   0x3   :  { %479 = vmatprep.subr.bf16.mxu0 %v542_v3  ;;  %519 = vmatprep.subr.bf16.mxu1 %v542_v3  ;;  %v28_v6 = vld [vmem:[%s705_s0 + $0x14] sm:$0xf]  ;;  %v26_v9 = vld [vmem:[%s705_s0 + $0x8] sm:$0xf]  ;;  %v545_v10 = vld [vmem:[%s706_s1 + $0x20] sm:$0xff]  }
   0x4   :  { %495 = vmatprep.mubr.bf16.mxu0 %v431_v2  ;;  %480 = vmatpush3.bf16.msra.mxu0 %v542_v3  ;;  %v643_v11 = vcombine.low %v31_v7, %v32_v8 }
   0x5   :  { %527 = vmatpush3.bf16.msra.mxu1 %v542_v3  ;;  %481 = vmatprep.subr.bf16.mxu0 %v543_v4 }
   0x6   :  { %52 = vrot.lane.b32.xlu1 %v27_v1, %s575_s25  ;;  %39 = vrot.lane.b32.xlu0 %v27_v1, %s576_s26 }
   0x7   :  { %520 = vmatprep.subr.bf16.mxu1 %v543_v4 }
   0x8   :  { %482 = vmatpush3.bf16.msra.mxu0 %v543_v4 }
   0x9   :  { %528 = vmatpush3.bf16.msra.mxu1 %v543_v4  ;;  %483 = vmatprep.subr.bf16.mxu0 %v544_v5 }
   0xa   :  { %65 = vrot.lane.b32.xlu1 %v27_v1, %s577_s11  ;;  %61 = vrot.lane.b32.xlu0 %v25_v0, %s577_s11 }
   0xb   :  { %521 = vmatprep.subr.bf16.mxu1 %v544_v5 }
   0xc   :  { %11 = vsyncpa [#allocation3], 0  ;;  %484 = vmatpush3.bf16.msra.mxu0 %v544_v5  ;;  %v546_v12 = vld [vmem:[%s706_s1 + $0x18] sm:$0xff]   ;;  %v547_v13 = vld [vmem:[%s706_s1 + $0x10] sm:$0xff]   ;;  %vm58_vm0 = vcmask 523264   ;;  %vm45_vm1 = vcmask 785408   ;;  %v320_v62 = vlaneseq }
   0xd   :  { %529 = vmatpush3.bf16.msra.mxu1 %v544_v5  ;;  %485 = vmatprep.subr.bf16.mxu0 %v545_v10  ;;  %v548_v14 = vld [vmem:[%s706_s1 + $0x8] sm:$0xff]   ;;  %v549_v15 = vld [vmem:[%s706_s1] sm:$0xff]   ;;  %vm71_vm2 = vcmask 261120   ;;  %vm359_vm3 = vcmask 1043456   ;;  %v578_v53 = vmov 0.0   ;;  %vm579_vm4 = vmmov 0  }
   0xe   :  { %41 = vrot.lane.b32.xlu1 %v28_v6, %s576_s26  ;;  %37 = vrot.lane.b32.xlu0 %v26_v9, %s576_s26  ;;  %v551_v52 = vld [vmem:[%s709_s4 + $0x8] ss:$0 sps:$4 sm:$0xff]   ;;  %v552_v55 = vld [vmem:[%s709_s4] sm:$0xff]   ;;  %v321_v5 = vshrl.u32 %v320_v62, 7  ;;  %vm296_vm5 = vcmask 195584   ;;  %s580_s30 = smov [#allocation2]  }
   0xf   :  { %522 = vmatprep.subr.bf16.mxu1 %v545_v10  ;;  %v361_v54 = vsel %vm359_vm3, %v551_v52, 0  ;;  %v430_v60 = vld [vmem:[%s707_s2] ss:$0 sm:$0xff]  ;;  %s419_s7 = sshll.u32 %s580_s30, 4  ;;  %s420_s7 = int_to_ptr.vmem [resolvable:$true] %s419_s7 }
  0x10   :  { %486 = vmatpush3.bf16.msra.mxu0 %v545_v10  ;;  %s553_s8 = scalar_lea.vmem %s420_s7, 128  ;;  %p558_p1 = scmp.lt.s32.totalorder %s420_s7, %s420_s7 }
  0x11   :  { %530 = vmatpush3.bf16.msra.mxu1 %v545_v10  ;;  %487 = vmatprep.subr.bf16.mxu0 %v546_v12  ;;  %p554_p0 = scmp.ne.s32.totalorder %s420_s7, %s553_s8  ;;  %p559_p2 = scmp.lt.s32.totalorder %s553_s8, %s553_s8 }
  0x12   :  { %54 = vrot.lane.b32.xlu1 %v28_v6, %s575_s25  ;;  %50 = vrot.lane.b32.xlu0 %v26_v9, %s575_s25 }
  0x13   :  { %523 = vmatprep.subr.bf16.mxu1 %v546_v12  ;;  %p560_p3 = por %p559_p2, %p558_p1 }
  0x14   :  { %488 = vmatpush3.bf16.msra.mxu0 %v546_v12 }
  0x15   :  { %531 = vmatpush3.bf16.msra.mxu1 %v546_v12  ;;  %489 = vmatprep.subr.bf16.mxu0 %v547_v13  ;;  %p561_p4 = pnand %p560_p3, %p554_p0 }
  0x16   :  { %67 = vrot.lane.b32.xlu1 %v28_v6, %s577_s11  ;;  %63 = vrot.lane.b32.xlu0 %v26_v9, %s577_s11 }
  0x17   :  { %524 = vmatprep.subr.bf16.mxu1 %v547_v13 }
  0x18   :  { %490 = vmatpush3.bf16.msra.mxu0 %v547_v13 }
  0x19   :  { %532 = vmatpush3.bf16.msra.mxu1 %v547_v13  ;;  %491 = vmatprep.subr.bf16.mxu0 %v548_v14 }
  0x1a   :  { %525 = vmatprep.subr.bf16.mxu1 %v548_v14 }
  0x1c   :  { %492 = vmatpush3.bf16.msra.mxu0 %v548_v14 }
  0x1d   :  { %533 = vmatpush3.bf16.msra.mxu1 %v548_v14  ;;  %493 = vmatprep.subr.bf16.mxu0 %v549_v15 }
  0x1e   :  { %526 = vmatprep.subr.bf16.mxu1 %v549_v15 }
  0x20   :  { %494 = vmatpush3.bf16.msra.mxu0 %v549_v15 }
  0x21   :  { %534 = vmatpush3.bf16.msra.mxu1 %v549_v15 }
  0x22   :  { %511 = vmatprep.subr.bf16.mxu1 %v578_v53 }
  0x74   :  { %v49_v16 = vpop.permute.xlu1 %48  ;;  %v36_v17 = vpop.permute.xlu0 %35 }
  0x75   :  { %v56_v18 = vrot.slane %v49_v16, 4  ;;  %v43_v19 = vrot.slane %v36_v17, 4 }
  0x77   :  { %v76_v24 = vsel %vm58_vm0, %v49_v16, %v56_v18  ;;  %v74_v25 = vsel %vm45_vm1, %v36_v17, %v43_v19 }
  0x78   :  { %v53_v20 = vpop.permute.xlu1 %52  ;;  %v40_v21 = vpop.permute.xlu0 %39 }
  0x79   :  { %v57_v22 = vrot.slane %v53_v20, 4  ;;  %v44_v23 = vrot.slane %v40_v21, 4 }
  0x7b   :  { %v77_v26 = vsel %vm58_vm0, %v53_v20, %v57_v22  ;;  %v75_v27 = vsel %vm45_vm1, %v40_v21, %v44_v23  ;;  %v330_v20 = vsub.s32 7, %v321_v5 }
  0x7c   :  { %v433_v28 = vcombine.low %v76_v24, %v77_v26  ;;  %v432_v29 = vcombine.low %v74_v25, %v75_v27  ;;  %v66_v30 = vpop.permute.xlu1 %65  ;;  %v62_v31 = vpop.permute.xlu0 %61 }
  0x7d   :  { %v70_v32 = vrot.slane %v66_v30, 4  ;;  %v69_v33 = vrot.slane %v62_v31, 4 }
  0x7e   :  { %496 = vmatmul.mubr.bf16.vlgmr.msra.gmra.mxu0 %v432_v29 }
  0x7f   :  { %499 = vmatprep.mubr.bf16.mxu0 %v433_v28  ;;  %v79_v36 = vsel %vm71_vm2, %v66_v30, %v70_v32  ;;  %v78_v37 = vsel %vm71_vm2, %v62_v31, %v69_v33 }
  0x80   :  { %v42_v34 = vpop.permute.xlu1 %41  ;;  %v38_v35 = vpop.permute.xlu0 %37  ;;  %v434_v38 = vcombine.low %v78_v37, %v79_v36 }
  0x81   :  { %v47_v46 = vsel %vm45_vm1, %v44_v23, %v42_v34  ;;  %v46_v47 = vsel %vm45_vm1, %v43_v19, %v38_v35  ;;  %v319_v19 = vld [vmem:[%s708_s3] sm:$0xff] }
  0x82   :  { %v436_v51 = vcombine.low %v46_v47, %v47_v46 }
  0x84   :  { %v55_v39 = vpop.permute.xlu1 %54  ;;  %v51_v40 = vpop.permute.xlu0 %50 }
  0x85   :  { %v59_v41 = vsel %vm58_vm0, %v56_v18, %v51_v40  ;;  %v60_v42 = vsel %vm58_vm0, %v57_v22, %v55_v39 }
  0x86   :  { %500 = vmatmul.mubr.bf16.gmra.mxu0 %v434_v38  ;;  %v437_v43 = vcombine.low %v59_v41, %v60_v42 }
  0x87   :  { %503 = vmatprep.mubr.bf16.mxu0 %v643_v11  ;;  %v322_v11 = vsub.s32 6, %v321_v5 }
  0x88   :  { %v68_v44 = vpop.permute.xlu1 %67  ;;  %507 = vmatprep.mubr.bf16.mxu1 %v437_v43  ;;  %v64_v45 = vpop.permute.xlu0 %63 }
  0x89   :  { %v73_v48 = vsel %vm71_vm2, %v70_v32, %v68_v44  ;;  %v72_v49 = vsel %vm71_vm2, %v69_v33, %v64_v45  ;;  %v323_v25 = vrot.slane %v319_v19, %v322_v11 }
  0x8a   :  { %v438_v50 = vcombine.low %v72_v49, %v73_v48 }
  0x8c   :  { %508 = vmatmul.mubr.bf16.vlgmr.msra.gmra.mxu1 %v438_v50 }
  0x8d   :  { %512 = vmatpush3.bf16.msra.mxu1 %v361_v54  ;;  %515 = vmatprep.mubr.msk.bf16.mxu1 %vm579_vm4, %v578_v53 }
  0x8e   :  { %504 = vmatmul.mubr.bf16.gmra.mxu0 %v436_v51  ;;  %513 = vmatprep.subr.bf16.mxu1 %v578_v53 }
  0x91   :  { %514 = vmatpush3.bf16.msra.mxu1 %v552_v55 }
 0x13e   :  { %v497_v56 = vpop.f32.mrf.mxu0 }
 0x13f   :  { %v226_v63 = vadd.f32 %v497_v56, %v430_v60 }
 0x140   :  { %v217_v57 = vpop.f32.mrf.mxu0 }
 0x141   :  { %v218_v3 = vadd.f32 %v430_v60, %v217_v57  ;;  %v282_v6 = vmax.f32 %v226_v63, 0.0 }
 0x142   :  { %v498_v58 = vpop.f32.mrf.mxu0 }
 0x143   :  { %v280_v14 = vmax.f32 %v218_v3, 0.0  ;;  %v229_v15 = vadd.f32 %v498_v58, %v430_v60  ;;  %v298_v22 = vsel %vm296_vm5, %v282_v6, -inf }
 0x144   :  { %v220_v59 = vpop.f32.mrf.mxu0 }
 0x145   :  { %v221_v16 = vadd.f32 %v430_v60, %v220_v59  ;;  %v297_v32 = vsel %vm296_vm5, %v280_v14, -inf  ;;  %v283_v33 = vmax.f32 %v229_v15, 0.0 }
 0x146   :  { %v501_v61 = vpop.f32.mrf.mxu0 }
 0x147   :  { %v242_v0 = vadd.f32 %v501_v61, %v430_v60  ;;  %v281_v34 = vmax.f32 %v221_v16, 0.0  ;;  %v309_v55 = vsel %vm296_vm5, %v283_v33, -inf  ;;  %v447_v16 = vld [vmem:[%s710_s5] ss:$0 sm:$0xff] }
 0x148   :  { %v233_v1 = vpop.f32.mrf.mxu0 }
 0x149   :  { %v234_v2 = vadd.f32 %v430_v60, %v233_v1  ;;  %v286_v7 = vmax.f32 %v242_v0, 0.0  ;;  %v308_v56 = vsel %vm296_vm5, %v281_v34, -inf  ;;  %v331_v1 = vrot.slane %v319_v19, %v330_v20 }
 0x14a   :  { %v502_v4 = vpop.f32.mrf.mxu0 }
 0x14b   :  { %v245_v8 = vadd.f32 %v502_v4, %v430_v60  ;;  %v284_v12 = vmax.f32 %v234_v2, 0.0  ;;  %v301_v23 = vsel %vm296_vm5, %v286_v7, -inf }
 0x14c   :  { %v236_v9 = vpop.f32.mrf.mxu0  ;;  %v509_v10 = vpop.f32.mrf.mxu1  ;;  %v302_v38 = vmax.f32 %v298_v22, %v301_v23 }
 0x14d   :  { %v237_v13 = vadd.f32 %v430_v60, %v236_v9  ;;  %v287_v24 = vmax.f32 %v245_v8, 0.0  ;;  %v299_v28 = vsel %vm296_vm5, %v284_v12, -inf  ;;  %v274_v44 = vadd.f32 %v509_v10, %v430_v60 }
 0x14e   :  { %v505_v17 = vpop.f32.mrf.mxu0  ;;  %v265_v18 = vpop.f32.mrf.mxu1  ;;  %v300_v42 = vmax.f32 %v297_v32, %v299_v28 }
 0x14f   :  { %v258_v21 = vadd.f32 %v505_v17, %v430_v60  ;;  %v285_v29 = vmax.f32 %v237_v13, 0.0  ;;  %v266_v35 = vadd.f32 %v430_v60, %v265_v18  ;;  %v312_v43 = vsel %vm296_vm5, %v287_v24, -inf }
 0x150   :  { %v249_v26 = vpop.f32.mrf.mxu0  ;;  %v510_v27 = vpop.f32.mrf.mxu1  ;;  %v313_v59 = vmax.f32 %v309_v55, %v312_v43  ;;  %v294_v0 = vmax.f32 %v274_v44, 0.0 }
 0x151   :  { %v290_v30 = vmax.f32 %v258_v21, 0.0  ;;  %v250_v31 = vadd.f32 %v430_v60, %v249_v26  ;;  %v310_v47 = vsel %vm296_vm5, %v285_v29, -inf  ;;  %v292_v52 = vmax.f32 %v266_v35, 0.0 }
 0x152   :  { %v506_v36 = vpop.f32.mrf.mxu0  ;;  %v268_v37 = vpop.f32.mrf.mxu1  ;;  %v277_v54 = vadd.f32 %v510_v27, %v430_v60  ;;  %v311_v61 = vmax.f32 %v308_v56, %v310_v47  ;;  %v332_v9 = vmul.f32 %v331_v1, %v294_v0 }
 0x153   :  { %v305_v39 = vsel %vm296_vm5, %v290_v30, -inf  ;;  %v288_v40 = vmax.f32 %v250_v31, 0.0  ;;  %v261_v41 = vadd.f32 %v506_v36, %v430_v60  ;;  %v269_v45 = vadd.f32 %v430_v60, %v268_v37 }
 0x154   :  { %v252_v46 = vpop.f32.mrf.mxu0  ;;  %v306_v51 = vmax.f32 %v302_v38, %v305_v39  ;;  %v324_v3 = vmul.f32 %v323_v25, %v292_v52  ;;  %v295_v4 = vmax.f32 %v277_v54, 0.0 }
 0x155   :  { %v303_v48 = vsel %vm296_vm5, %v288_v40, -inf  ;;  %v291_v49 = vmax.f32 %v261_v41, 0.0  ;;  %v253_v50 = vadd.f32 %v430_v60, %v252_v46  ;;  %v293_v63 = vmax.f32 %v269_v45, 0.0 }
 0x156   :  { %v304_v53 = vmax.f32 %v300_v42, %v303_v48  ;;  %v333_v10 = vmul.f32 %v331_v1, %v295_v4 }
 0x157   :  { %v316_v57 = vsel %vm296_vm5, %v291_v49, -inf  ;;  %v289_v58 = vmax.f32 %v253_v50, 0.0  ;;  %v325_v7 = vmul.f32 %v323_v25, %v293_v63 }
 0x158   :  { %v307_v62 = vmax.f32 %v304_v53, %v306_v51  ;;  %v317_v5 = vmax.f32 %v313_v59, %v316_v57 }
 0x159   :  { %v314_v2 = vsel %vm296_vm5, %v289_v58, -inf }
 0x15a   :  { %v315_v6 = vmax.f32 %v311_v61, %v314_v2  ;;  %v326_v60 = vmax.f32 %v307_v62, %v324_v3 }
 0x15c   :  { %v318_v8 = vmax.f32 %v315_v6, %v317_v5  ;;  %v334_v12 = vmax.f32 %v326_v60, %v332_v9 }
 0x15e   :  { %v327_v11 = vmax.f32 %v318_v8, %v325_v7 }
 0x160   :  { %v335_v13 = vmax.f32 %v327_v11, %v333_v10 }
 0x162   :  { %v336_v14 = vpack.c.bf16 %v335_v13, %v334_v12 }
 0x164   :  { %516 = vmatmul.mubr.msk.bf16.vlgmr.msra.gmra.mxu1 %vm296_vm5, %v336_v14 }
 0x224   :  { %v397_v15 = vpop.f32.mrf.mxu1 }
 0x225   :  { %v398_v19 = vadd.f32 %v447_v16, %v397_v15 }
 0x226   :  { %v517_v17 = vpop.f32.mrf.mxu1 }
 0x228   :  { %v400_v18 = vpop.f32.mrf.mxu1 }
 0x229   :  { %v401_v20 = vadd.f32 %v447_v16, %v400_v18 }
 0x22a   :  { %v518_v21 = vpop.f32.mrf.mxu1 }
 0x22b   :  { %v458_v22 = vpack.c.bf16 %v401_v20, %v398_v19 }
 0x22d   :  { %459 = vst [vmem:[#allocation2] sm:$0xff] %v458_v22  }
 0x22e   :  { %564 = shalt.err (!%p561_p4)
}
 0x22f   :  { %s581_s9 = smov 4  }
 0x230   :  { %425 = dma.vmem_to_hbm [thread:$0]  %s420_s7, 128, %s711_s6, [#allocation3], %s575_s25, %s575_s25, %s581_s9  }
 0x231   :  { %573 = dma.done.wait [#allocation3], 128  }
 0x232   :  { %574 = vsyncadd [#allocation3], 4294967168 }
 0x233   :  { %429 = vsyncpa [#allocation3], 1 }

</bundles_post_ra>
